<compile_context>
chip_gen: v7x
topology: tpu7x:2x2x1
jax: 0.10.0
libtpu: 0.0.40
codegen_flags: <defaults>
</compile_context>

<pallas_src>
import jax
import jax.numpy as jnp
from jax.experimental import pallas as pl
from jax.experimental.pallas import tpu as pltpu

IN_FEATURES = 784
OUT_FEATURES = 10
N_PAD = 128   # lane-dense output width (>= OUT_FEATURES)


def _round_up(x, m):
    return (x + m - 1) // m * m


def linear_kernel(x_ref, w_ref, b_ref, o_ref):
    # x arrives as raw f32 rows (no wrapper-side pad/cast pass); cast to bf16
    # on the VPU (huge slack in this HBM-bound kernel) right before the MXU
    # matmul.  Accumulate in f32; bias add in f32 on the VPU.
    x_bf16 = x_ref[...].astype(jnp.bfloat16)
    acc = jnp.dot(x_bf16, w_ref[...], preferred_element_type=jnp.float32)
    o_ref[...] = acc + b_ref[...]


def mnist_logistic_forward(x, w_t, b, *, tb=1024, xla_fallback_threshold=0):
    """Forward of Mnist_Logistic (nn.Linear(784, 10)).

    x   : (B, 784) float32
    w_t : (784, 10) float32  (PyTorch weight, transposed)
    b   : (1, 10) or (10,) float32
    returns (B, 10) float32
    """
    B = x.shape[0]

    # Optional fused-XLA fast path for tiny batches (review: at B << 512 one
    # grid step + launch overhead can't beat a fused XLA dot).  Disabled by
    # default so this module always runs the Pallas kernel.
    if B <= xla_fallback_threshold:
        return x @ w_t + jnp.reshape(b, (1, OUT_FEATURES))

    # Row tile: multiple of 8 sublanes, and clamped so there are >= 2 grid
    # steps whenever the batch allows it (megacore / v7x dual-TC sharding via
    # dimension_semantics=("parallel",)).
    b8 = _round_up(B, 8)
    if b8 >= 16:
        tb_eff = min(tb, _round_up(pl.cdiv(b8, 2), 8))
    else:
        tb_eff = b8
    tb_eff = max(8, _round_up(tb_eff, 8))
    grid = (pl.cdiv(B, tb_eff),)

    # Tiny, loaded-once operands are padded/cast in the wrapper (cheap, ~200 KiB
    # total); x — the dominant HBM traffic — is passed through untouched.
    w_p = jnp.zeros((IN_FEATURES, N_PAD), jnp.bfloat16).at[:, :OUT_FEATURES].set(
        w_t.astype(jnp.bfloat16))
    b_p = jnp.zeros((1, N_PAD), jnp.float32).at[:, :OUT_FEATURES].set(
        jnp.reshape(b, (1, OUT_FEATURES)).astype(jnp.float32))

    # VMEM budget: double-buffered f32 x tile + double-buffered f32 out tile +
    # resident W/bias, plus headroom.  Kept within the 16 MiB scoped default
    # on v5e and well inside v7x's 64 MiB physical VMEM per TC.
    vmem_bytes = (2 * tb_eff * IN_FEATURES * 4        # x tiles (f32, 2 bufs)
                  + 2 * tb_eff * N_PAD * 4            # out tiles (f32, 2 bufs)
                  + 2 * IN_FEATURES * N_PAD * 2       # resident W (bf16)
                  + (2 << 20))                        # headroom / internal scratch
    vmem_bytes = int(min(max(vmem_bytes, 16 << 20), 64 << 20))

    cost = pl.CostEstimate(
        flops=2 * B * IN_FEATURES * OUT_FEATURES,
        transcendentals=0,
        bytes_accessed=(B * IN_FEATURES * 4            # read x (raw f32)
                        + IN_FEATURES * N_PAD * 2      # read W (bf16, once)
                        + N_PAD * 4                    # read bias
                        + B * N_PAD * 4),              # write padded logits
    )

    out = pl.pallas_call(
        linear_kernel,
        out_shape=jax.ShapeDtypeStruct((B, N_PAD), jnp.float32),
        grid_spec=pltpu.PrefetchScalarGridSpec(
            num_scalar_prefetch=0,
            grid=grid,
            in_specs=[
                pl.BlockSpec((tb_eff, IN_FEATURES), lambda i: (i, 0)),  # streamed raw f32 x
                pl.BlockSpec((IN_FEATURES, N_PAD), lambda i: (0, 0)),   # VMEM-resident W
                pl.BlockSpec((1, N_PAD), lambda i: (0, 0)),             # VMEM-resident bias
            ],
            out_specs=pl.BlockSpec((tb_eff, N_PAD), lambda i: (i, 0)),  # lane-dense out
        ),
        compiler_params=pltpu.CompilerParams(
            dimension_semantics=("parallel",),
            vmem_limit_bytes=vmem_bytes,
        ),
        cost_estimate=cost,
    )(x, w_p, b_p)

    # TODO(synk): fusing the downstream log-softmax / NLL (or any consumer of
    # the padded slab) into this kernel would remove the padded-f32 writeback
    # and the wrapper slice below, but that is outside forward() semantics.
    return out[:, :OUT_FEATURES]


def init_params(key):
    # Mimic nn.Linear default init: U(-1/sqrt(fan_in), 1/sqrt(fan_in)).
    kw, kb = jax.random.split(key)
    bound = 1.0 / jnp.sqrt(jnp.float32(IN_FEATURES))
    w = jax.random.uniform(kw, (OUT_FEATURES, IN_FEATURES),
                           minval=-bound, maxval=bound, dtype=jnp.float32)
    b = jax.random.uniform(kb, (OUT_FEATURES,),
                           minval=-bound, maxval=bound, dtype=jnp.float32)
    return w.T, b.reshape(1, OUT_FEATURES)


if __name__ == "__main__":
    key = jax.random.PRNGKey(0)
    k_x, k_p = jax.random.split(key)

    B = 64  # same batch size the reference script uses
    x = jax.random.uniform(k_x, (B, IN_FEATURES), dtype=jnp.float32)
    w_t, bias = init_params(k_p)

    fwd = jax.jit(mnist_logistic_forward,
                  static_argnames=("tb", "xla_fallback_threshold"))

    out = jax.block_until_ready(fwd(x, w_t, bias))
    ref = x @ w_t + bias
    assert out.shape == (B, OUT_FEATURES)
    # bf16 MXU inputs -> tolerance covers quantization (accumulation is f32).
    assert jnp.allclose(out, ref, atol=5e-2, rtol=5e-2), \
        float(jnp.max(jnp.abs(out - ref)))

    # Exercise the multi-step, ragged-edge row-tiled grid path (300 % 128 != 0:
    # the last block's reads/writes are edge-masked by Pallas).
    B2 = 300
    x2 = jax.random.uniform(jax.random.PRNGKey(1), (B2, IN_FEATURES),
                            dtype=jnp.float32)
    out2 = jax.block_until_ready(fwd(x2, w_t, bias, tb=128))
    ref2 = x2 @ w_t + bias
    assert out2.shape == (B2, OUT_FEATURES)
    assert jnp.allclose(out2, ref2, atol=5e-2, rtol=5e-2), \
        float(jnp.max(jnp.abs(out2 - ref2)))

    print("KERNEL_OK")
</pallas_src>

<mosaic_0001>
module attributes {stable_mosaic.version = 11 : i64} {
  func.func @linear_kernel(%arg0: i32, %arg1: memref<32x784xf32, #tpu.memory_space<vmem>>, %arg2: memref<784x128xbf16, #tpu.memory_space<vmem>>, %arg3: memref<1x128xf32, #tpu.memory_space<vmem>>, %arg4: memref<32x128xf32, #tpu.memory_space<vmem>>) attributes {dimension_semantics = [#tpu.dimension_semantics<parallel>], iteration_bounds = array<i64: 2>, scalar_prefetch = 0 : i64, scratch_operands = 0 : i64, tpu.core_type = #tpu.core_type<tc>, window_params = [{transform_indices = @transform_0, window_bounds = array<i64: 32, 784>}, {pipeline_mode = #tpu.pipeline_mode<synchronous>, transform_indices = @transform_1, window_bounds = array<i64: 784, 128>}, {pipeline_mode = #tpu.pipeline_mode<synchronous>, transform_indices = @transform_2, window_bounds = array<i64: 1, 128>}, {transform_indices = @transform_3, window_bounds = array<i64: 32, 128>}]} {
    %c0 = arith.constant 0 : index
    %c0_0 = arith.constant 0 : index
    %0 = vector.load %arg1[%c0, %c0_0] : memref<32x784xf32, #tpu.memory_space<vmem>>, vector<32x784xf32>
    %1 = arith.truncf %0 : vector<32x784xf32> to vector<32x784xbf16>
    %c0_1 = arith.constant 0 : index
    %c0_2 = arith.constant 0 : index
    %2 = vector.load %arg2[%c0_1, %c0_2] : memref<784x128xbf16, #tpu.memory_space<vmem>>, vector<784x128xbf16>
    %cst = arith.constant dense<0.000000e+00> : vector<32x128xf32>
    %3 = tpu.matmul %1, %2, %cst {dimension_numbers = #tpu.dot_dimension_numbers<[1], [0], [0], [1], [0, 0, 1, 1], [], []>} : vector<32x784xbf16>, vector<784x128xbf16>, vector<32x128xf32> -> vector<32x128xf32>
    %c0_3 = arith.constant 0 : index
    %c0_4 = arith.constant 0 : index
    %4 = vector.load %arg3[%c0_3, %c0_4] : memref<1x128xf32, #tpu.memory_space<vmem>>, vector<1x128xf32>
    %5 = vector.broadcast %4 : vector<1x128xf32> to vector<32x128xf32>
    %6 = arith.addf %3, %5 : vector<32x128xf32>
    %c0_5 = arith.constant 0 : index
    %c0_6 = arith.constant 0 : index
    %7 = vector.load %arg4[%c0_5, %c0_6] : memref<32x128xf32, #tpu.memory_space<vmem>>, vector<32x128xf32>
    tpu.vector_store %arg4[%c0_5, %c0_6], %6 {strides = array<i32>} : memref<32x128xf32, #tpu.memory_space<vmem>>, vector<32x128xf32>,
    return
  }
  func.func @transform_0(%arg0: i32) -> (i32, i32) {
    %c0_i32 = arith.constant 0 : i32
    %c0_i32_0 = arith.constant 0 : i32
    return %arg0, %c0_i32 : i32, i32
  }
  func.func @transform_1(%arg0: i32) -> (i32, i32) {
    %c0_i32 = arith.constant 0 : i32
    %c0_i32_0 = arith.constant 0 : i32
    %c0_i32_1 = arith.constant 0 : i32
    return %c0_i32, %c0_i32_0 : i32, i32
  }
  func.func @transform_2(%arg0: i32) -> (i32, i32) {
    %c0_i32 = arith.constant 0 : i32
    %c0_i32_0 = arith.constant 0 : i32
    %c0_i32_1 = arith.constant 0 : i32
    return %c0_i32, %c0_i32_0 : i32, i32
  }
  func.func @transform_3(%arg0: i32) -> (i32, i32) {
    %c0_i32 = arith.constant 0 : i32
    %c0_i32_0 = arith.constant 0 : i32
    return %arg0, %c0_i32 : i32, i32
  }
}

</mosaic_0001>

<bundles_post_ra>
// kernel: mnist_logistic_forward.1
= control target key start
LH: loop header
LB: loop body
LE: loop exit
PB: predicated region body
PF: predicated region fallthrough
CT: control target
= control target key end

     0   :  { %s1124_s12 = smov 0   ;;  %s1327_s0 = inlined_call_operand.vmem [shape: f32[64,784], index: 0, kind: input, shape index: {}]   ;;  %s1328_s1 = inlined_call_operand.vmem [shape: bf16[784,128], index: 1, kind: input, shape index: {}]   ;;  %s1329_s2 = inlined_call_operand.vmem [shape: f32[1,128], index: 2, kind: input, shape index: {}]   ;;  %s1330_s3 = inlined_call_operand.vmem [shape: f32[64,128], index: 3, kind: output, shape index: {}]  }
   0x1 LB: > { %s882_s13 = sadd.s32 4294967295, %s1102_s12   ;;  %p886_p0 = scmp.ge.s32.totalorder %s1102_s12, 1  ;;  %s1102_s12 = sphi %s1124_s12, %s13_s12  }
   0x2   : > { %p139_p1 = scmp.lt.s32.totalorder %s1102_s12, 3 }
   0x4   : > { %p140_p2 = pnand %p886_p0, %p139_p1 }
   0x5   : > { %v1047_v0 = vld [vmem:[%s1328_s1 + $0x40] sm:$0xff] (!%p140_p2)   ;;  %v1051_v4 = vld [vmem:[%s1328_s1 + $0x48] sm:$0xff] (!%p140_p2)   ;;  %v1055_v8 = vld [vmem:[%s1328_s1 + $0x50] sm:$0xff] (!%p140_p2)   ;;  %s887_s17 = sshll.u32 (!%p140_p2), %s882_s13, 2  ;;  %vm619_vm0 = vcmask (!%p140_p2), 130048  }
   0x6   : > { %143 = sbr.rel (%p140_p2) target bundleno = 300 (0x12c), region = 32  ;;  %v1048_v1 = vld [vmem:[%s1328_s1] sm:$0xff] (!%p140_p2)   ;;  %945 = vmatprep.subr.bf16.mxu0 (!%p140_p2), %v1047_v0  ;;  %v1052_v5 = vld [vmem:[%s1328_s1 + $0x8] sm:$0xff] (!%p140_p2)   ;;  %v1056_v9 = vld [vmem:[%s1328_s1 + $0x10] sm:$0xff] (!%p140_p2)   ;;  %p165_p3 = scmp.lt.s32.totalorder (!%p140_p2), %s887_s17, 7 }
   0x7   : > { %v1049_v2 = vld [vmem:[%s1328_s1 + $0xc0] sm:$0xff] (!%p140_p2)   ;;  %946 = vmatpush3.bf16.msra.mxu0 (!%p140_p2), %v1048_v1  ;;  %v1053_v6 = vld [vmem:[%s1328_s1 + $0xc8] sm:$0xff] (!%p140_p2)   ;;  %v1057_v10 = vld [vmem:[%s1328_s1 + $0xd0] sm:$0xff] (!%p140_p2)  }
   0x8   : > { %v1050_v3 = vld [vmem:[%s1328_s1 + $0x80] sm:$0xff] (!%p140_p2)   ;;  %973 = vmatprep.subr.bf16.mxu1 (!%p140_p2), %v1049_v2  ;;  %947 = vmatprep.subr.bf16.mxu0 (!%p140_p2), %v1051_v4  ;;  %v1054_v7 = vld [vmem:[%s1328_s1 + $0x88] sm:$0xff] (!%p140_p2)   ;;  %v1058_v11 = vld [vmem:[%s1328_s1 + $0x90] sm:$0xff] (!%p140_p2)  }
   0x9   : > { %974 = vmatpush3.bf16.msra.mxu1 (!%p140_p2), %v1050_v3  ;;  %v1059_v12 = vld [vmem:[%s1328_s1 + $0x58] sm:$0xff] (!%p140_p2)   ;;  %v1063_v16 = vld [vmem:[%s1328_s1 + $0x60] sm:$0xff] (!%p140_p2)   ;;  %v1067_v20 = vld [vmem:[%s1328_s1 + $0x68] sm:$0xff] (!%p140_p2)  }
   0xa   : > { %975 = vmatprep.subr.bf16.mxu1 (!%p140_p2), %v1053_v6  ;;  %v1060_v13 = vld [vmem:[%s1328_s1 + $0x18] sm:$0xff] (!%p140_p2)   ;;  %v1064_v17 = vld [vmem:[%s1328_s1 + $0x20] sm:$0xff] (!%p140_p2)   ;;  %v1068_v21 = vld [vmem:[%s1328_s1 + $0x28] sm:$0xff] (!%p140_p2)  }
   0xb   : > { %948 = vmatpush3.bf16.msra.mxu0 (!%p140_p2), %v1052_v5  ;;  %v1061_v14 = vld [vmem:[%s1328_s1 + $0xd8] sm:$0xff] (!%p140_p2)   ;;  %v1065_v18 = vld [vmem:[%s1328_s1 + $0xe0] sm:$0xff] (!%p140_p2)   ;;  %v1069_v22 = vld [vmem:[%s1328_s1 + $0xe8] sm:$0xff] (!%p140_p2)  }
   0xc   : > { %949 = vmatprep.subr.bf16.mxu0 (!%p140_p2), %v1055_v8  ;;  %v1062_v15 = vld [vmem:[%s1328_s1 + $0x98] sm:$0xff] (!%p140_p2)   ;;  %v1066_v19 = vld [vmem:[%s1328_s1 + $0xa0] sm:$0xff] (!%p140_p2)   ;;  %v1070_v23 = vld [vmem:[%s1328_s1 + $0xa8] sm:$0xff] (!%p140_p2)  }
   0xd   : > { %976 = vmatpush3.bf16.msra.mxu1 %v1054_v7  ;;  %s1332_s17 = smov (!%p165_p3, %s887_s17), 7  ;;  %v1071_v24 = vld [vmem:[%s1328_s1 + $0x70] sm:$0xff]   ;;  %v1075_v28 = vld [vmem:[%s1328_s1 + $0x78] sm:$0xff]   ;;  %v1079_v38 = vld [vmem:[%s1328_s1 + $0x140] sm:$0xff]  }
   0xe   : > { %977 = vmatprep.subr.bf16.mxu1 %v1057_v10  ;;  %s1038_s14 = smul.u32 56, %s1332_s17  ;;  %v1072_v25 = vld [vmem:[%s1328_s1 + $0x30] sm:$0xff]   ;;  %v1076_v29 = vld [vmem:[%s1328_s1 + $0x38] sm:$0xff]   ;;  %v1080_v42 = vld [vmem:[%s1328_s1 + $0x100] sm:$0xff]  }
   0xf   : > { %950 = vmatpush3.bf16.msra.mxu0 %v1056_v9  ;;  %v1073_v26 = vld [vmem:[%s1328_s1 + $0xf0] sm:$0xff]   ;;  %v1077_v30 = vld [vmem:[%s1328_s1 + $0xf8] sm:$0xff]   ;;  %v1081_v46 = vld [vmem:[%s1328_s1 + $0x148] sm:$0xff]  }
  0x10   : > { %951 = vmatprep.subr.bf16.mxu0 %v1059_v12  ;;  %v1074_v27 = vld [vmem:[%s1328_s1 + $0xb0] sm:$0xff]   ;;  %s1227_s13 = scalar_lea.vmem %s1327_s0, %s1038_s14  ;;  %v1078_v34 = vld [vmem:[%s1328_s1 + $0xb8] sm:$0xff]   ;;  %v1082_v47 = vld [vmem:[%s1328_s1 + $0x108] sm:$0xff]  }
  0x11   : > { %978 = vmatpush3.bf16.msra.mxu1 %v1058_v11  ;;  %v179_v31 = vld [vmem:[%s1227_s13 + $0x8] sm:$0xff]  ;;  %v186_v32 = vld [vmem:[%s1227_s13 + $0x40] sm:$0xff]  ;;  %v185_v36 = vld [vmem:[%s1227_s13 + $0x38] sm:$0xff] }
  0x12   : > { %979 = vmatprep.subr.bf16.mxu1 %v1061_v14  ;;  %v207_v33 = vpack.c.bf16 %v186_v32, %v179_v31  ;;  %v178_v35 = vld [vmem:[%s1227_s13] sm:$0xff]  ;;  %v181_v39 = vld [vmem:[%s1227_s13 + $0x18] sm:$0xff]  ;;  %v188_v40 = vld [vmem:[%s1227_s13 + $0x50] sm:$0xff] }
  0x13   : > { %952 = vmatpush3.bf16.msra.mxu0 %v1060_v13  ;;  %v206_v37 = vpack.c.bf16 %v185_v36, %v178_v35  ;;  %v209_v41 = vpack.c.bf16 %v188_v40, %v181_v39  ;;  %v180_v43 = vld [vmem:[%s1227_s13 + $0x10] sm:$0xff]  ;;  %v187_v44 = vld [vmem:[%s1227_s13 + $0x48] sm:$0xff]  ;;  %v1085_v50 = vld [vmem:[%s1328_s1 + $0x158] sm:$0xff]  }
  0x14   : > { %953 = vmatprep.subr.bf16.mxu0 %v1063_v16  ;;  %658 = vmatprep.mubr.bf16.mxu0 %v207_v33  ;;  %v208_v45 = vpack.c.bf16 %v187_v44, %v180_v43  ;;  %v1083_v48 = vld [vmem:[%s1328_s1 + $0x150] sm:$0xff]   ;;  %v1086_v51 = vld [vmem:[%s1328_s1 + $0x118] sm:$0xff]   ;;  %v1087_v54 = vld [vmem:[%s1328_s1 + $0x160] sm:$0xff]  }
  0x15   : > { %980 = vmatpush3.bf16.msra.mxu1 %v1062_v15  ;;  %707 = vmatprep.mubr.bf16.mxu1 %v209_v41  ;;  %v1084_v49 = vld [vmem:[%s1328_s1 + $0x110] sm:$0xff]   ;;  %v193_v52 = vld [vmem:[%s1227_s13 + $0x78] sm:$0xff]  ;;  %v199_v57 = vld [vmem:[%s1227_s13 + $0xa8] sm:$0xff] }
  0x16   : > { %981 = vmatprep.subr.bf16.mxu1 %v1065_v18  ;;  %v200_v53 = vld [vmem:[%s1227_s13 + $0xb0] sm:$0xff]  ;;  %v1088_v58 = vld [vmem:[%s1328_s1 + $0x120] sm:$0xff]   ;;  %v195_v60 = vld [vmem:[%s1227_s13 + $0x88] sm:$0xff] }
  0x17   : > { %954 = vmatpush3.bf16.msra.mxu0 %v1064_v17  ;;  %v214_v55 = vpack.c.bf16 %v200_v53, %v193_v52  ;;  %v192_v56 = vld [vmem:[%s1227_s13 + $0x70] sm:$0xff]  ;;  %v202_v61 = vld [vmem:[%s1227_s13 + $0xc0] sm:$0xff]  ;;  %v201_v0 = vld [vmem:[%s1227_s13 + $0xb8] sm:$0xff] }
  0x18   : > { %955 = vmatprep.subr.bf16.mxu0 %v1067_v20  ;;  %v213_v59 = vpack.c.bf16 %v199_v57, %v192_v56  ;;  %v194_v62 = vld [vmem:[%s1227_s13 + $0x80] sm:$0xff]  ;;  %v216_v63 = vpack.c.bf16 %v202_v61, %v195_v60  ;;  %v1089_v1 = vld [vmem:[%s1328_s1 + $0x168] sm:$0xff]   ;;  %v1091_v5 = vld [vmem:[%s1328_s1 + $0x170] sm:$0xff]  }
  0x19   : > { %982 = vmatpush3.bf16.msra.mxu1 %v1066_v19  ;;  %v215_v2 = vpack.c.bf16 %v201_v0, %v194_v62  ;;  %v1093_v3 = vld [vmem:[%s1328_s1 + $0x180] sm:$0xff]   ;;  %v1090_v4 = vld [vmem:[%s1328_s1 + $0x128] sm:$0xff]   ;;  %v184_v9 = vld [vmem:[%s1227_s13 + $0x30] sm:$0xff] }
  0x1a   : > { %983 = vmatprep.subr.bf16.mxu1 %v1069_v22  ;;  %v183_v6 = vld [vmem:[%s1227_s13 + $0x28] sm:$0xff]  ;;  %v190_v7 = vld [vmem:[%s1227_s13 + $0x60] sm:$0xff]  ;;  %v205_v12 = vld [vmem:[%s1227_s13 + $0xd8] sm:$0xff] }
  0x1b   : > { %956 = vmatpush3.bf16.msra.mxu0 %v1068_v21  ;;  %v211_v8 = vpack.c.bf16 %v190_v7, %v183_v6  ;;  %v191_v10 = vld [vmem:[%s1227_s13 + $0x68] sm:$0xff]  ;;  %v198_v11 = vld [vmem:[%s1227_s13 + $0xa0] sm:$0xff]  ;;  %v1092_v13 = vld [vmem:[%s1328_s1 + $0x130] sm:$0xff]  }
  0x1c   : > { %957 = vmatprep.subr.bf16.mxu0 %v1071_v24  ;;  %v212_v14 = vpack.c.bf16 %v191_v10, %v184_v9  ;;  %v219_v15 = vpack.c.bf16 %v205_v12, %v198_v11  ;;  %v1094_v16 = vld [vmem:[%s1328_s1 + $0x178] sm:$0xff]   ;;  %v182_v18 = vld [vmem:[%s1227_s13 + $0x20] sm:$0xff]  ;;  %v204_v21 = vld [vmem:[%s1227_s13 + $0xd0] sm:$0xff] }
  0x1d   : > { %984 = vmatpush3.bf16.msra.mxu1 %v1070_v23  ;;  %v1095_v17 = vld [vmem:[%s1328_s1 + $0x138] sm:$0xff]   ;;  %v196_v24 = vld [vmem:[%s1227_s13 + $0x90] sm:$0xff] }
  0x1e   : > { %985 = vmatprep.subr.bf16.mxu1 %v1073_v26  ;;  %v189_v19 = vld [vmem:[%s1227_s13 + $0x58] sm:$0xff] }
  0x1f   : > { %958 = vmatpush3.bf16.msra.mxu0 %v1072_v25  ;;  %v197_v20 = vld [vmem:[%s1227_s13 + $0x98] sm:$0xff]  ;;  %v210_v22 = vpack.c.bf16 %v189_v19, %v182_v18  ;;  %v203_v25 = vld [vmem:[%s1227_s13 + $0xc8] sm:$0xff]  ;;  %s890_s13 = sshll.u32 %s1332_s17, 3 }
  0x20   : > { %959 = vmatprep.subr.bf16.mxu0 %v1075_v28  ;;  %v218_v23 = vpack.c.bf16 %v204_v21, %v197_v20  ;;  %v217_v26 = vpack.c.bf16 %v203_v25, %v196_v24  ;;  %v891_v28 = vld [vmem:[%s1329_s2] ss:$0 sm:$0xff]  ;;  %s175_s22 = scalar_lea.vmem %s1330_s3, %s890_s13 }
  0x21   : > { %986 = vmatpush3.bf16.msra.mxu1 %v1074_v27 }
  0x22   : > { %987 = vmatprep.subr.bf16.mxu1 %v1077_v30 }
  0x23   : > { %960 = vmatpush3.bf16.msra.mxu0 %v1076_v29 }
  0x24   : > { %1001 = vmatprep.subr.bf16.mxu0 %v1079_v38 }
  0x25   : > { %988 = vmatpush3.bf16.msra.mxu1 %v1078_v34 }
  0x26   : > { %659 = vmatmul.mubr.bf16.vlgmr.msra.gmra.mrb[0].mxu0 %v206_v37  ;;  %1032 = vmatprep.subr.bf16.mxu1 %v1093_v3 }
  0x27   : > { %1002 = vmatpush3.bf16.msra.mxu0 %v1080_v42  ;;  %666 = vmatprep.mubr.bf16.mxu0 %v214_v55 }
  0x28   : > { %708 = vmatmul.mubr.bf16.vlgmr.msra.gmra.mrb[0].mxu1 %v208_v45  ;;  %1003 = vmatprep.subr.bf16.mxu0 %v1081_v46 }
  0x29   : > { %715 = vmatprep.mubr.bf16.mxu1 %v216_v63  ;;  %1033 = vmatpush3.bf16.msra.mxu1 %v1093_v3 }
  0x2b   : > { %1004 = vmatpush3.bf16.msra.mxu0 %v1082_v47 }
  0x2c   : > { %1005 = vmatprep.subr.bf16.mxu0 %v1083_v48 }
  0x2e   : > { %667 = vmatmul.mubr.bf16.gmra.mrb[4].mxu0 %v213_v59 }
  0x2f   : > { %1006 = vmatpush3.bf16.msra.mxu0 %v1084_v49  ;;  %756 = vmatprep.mubr.bf16.mxu0 %v211_v8 }
  0x30   : > { %1007 = vmatprep.subr.bf16.mxu0 %v1085_v50  ;;  %716 = vmatmul.mubr.bf16.gmra.mrb[4].mxu1 %v215_v2 }
  0x31   : > { %1034 = vmatprep.mubr.msk.bf16.mxu1 %vm619_vm0, %v212_v14 }
  0x33   : > { %1008 = vmatpush3.bf16.msra.mxu0 %v1086_v51 }
  0x34   : > { %1009 = vmatprep.subr.bf16.mxu0 %v1087_v54 }
  0x37   : > { %1010 = vmatpush3.bf16.msra.mxu0 %v1088_v58 }
  0x38   : > { %1011 = vmatprep.subr.bf16.mxu0 %v1089_v1  ;;  %1035 = vmatmul.mubr.msk.bf16.vlgmr.msra.gmra.mrb[8].mxu1 %vm619_vm0, %v219_v15 }
  0x3b   : > { %1012 = vmatpush3.bf16.msra.mxu0 %v1090_v4 }
  0x3c   : > { %1013 = vmatprep.subr.bf16.mxu0 %v1091_v5 }
  0x3f   : > { %1014 = vmatpush3.bf16.msra.mxu0 %v1092_v13 }
  0x40   : > { %1015 = vmatprep.subr.bf16.mxu0 %v1094_v16 }
  0x43   : > { %1016 = vmatpush3.bf16.msra.mxu0 %v1095_v17 }
  0x46   : > { %757 = vmatmul.mubr.bf16.vlgmr.msra.gmra.mrb[8].mxu0 %v210_v22 }
  0x47   : > { %764 = vmatprep.mubr.bf16.mxu0 %v218_v23 }
  0x4e   : > { %765 = vmatmul.mubr.bf16.gmra.mrb[12].mxu0 %v217_v26 }
  0xf9   : > { %v961_v27 = vpop.f32.mrb[0].mxu0 }
  0xfa   : > { %v962_v29 = vpop.f32.mrb[1].mxu0 }
  0xfb   : > { %v963_v30 = vadd.f32 %v962_v29, %v961_v27  ;;  %v964_v31 = vpop.f32.mrb[2].mxu0  ;;  %v989_v32 = vpop.f32.mrb[0].mxu1 }
  0xfc   : > { %v965_v33 = vpop.f32.mrb[3].mxu0  ;;  %v990_v36 = vpop.f32.mrb[1].mxu1 }
  0xfd   : > { %v661_v34 = vadd.f32 %v963_v30, %v891_v28  ;;  %v966_v35 = vadd.f32 %v965_v33, %v964_v31  ;;  %v991_v37 = vadd.f32 %v990_v36, %v989_v32  ;;  %v992_v38 = vpop.f32.mrb[2].mxu1 }
  0xfe   : > { %v993_v40 = vpop.f32.mrb[3].mxu1 }
  0xff   : > { %v664_v39 = vadd.f32 %v966_v35, %v891_v28  ;;  %v710_v41 = vadd.f32 %v991_v37, %v661_v34  ;;  %v994_v42 = vadd.f32 %v993_v40, %v992_v38 }
 0x101   : > { %v713_v43 = vadd.f32 %v994_v42, %v664_v39  ;;  %v967_v44 = vpop.f32.mrb[4].mxu0 }
 0x102   : > { %v968_v45 = vpop.f32.mrb[5].mxu0 }
 0x103   : > { %v969_v46 = vadd.f32 %v968_v45, %v967_v44  ;;  %v970_v47 = vpop.f32.mrb[6].mxu0  ;;  %v995_v48 = vpop.f32.mrb[4].mxu1 }
 0x104   : > { %v971_v49 = vpop.f32.mrb[7].mxu0  ;;  %v996_v50 = vpop.f32.mrb[5].mxu1 }
 0x105   : > { %v669_v51 = vadd.f32 %v969_v46, %v891_v28  ;;  %v972_v52 = vadd.f32 %v971_v49, %v970_v47  ;;  %v997_v53 = vadd.f32 %v996_v50, %v995_v48  ;;  %v998_v54 = vpop.f32.mrb[6].mxu1 }
 0x106   : > { %v999_v55 = vpop.f32.mrb[7].mxu1 }
 0x107   : > { %v672_v56 = vadd.f32 %v972_v52, %v891_v28  ;;  %v718_v57 = vadd.f32 %v997_v53, %v669_v51  ;;  %v1000_v58 = vadd.f32 %v999_v55, %v998_v54 }
 0x109   : > { %v721_v59 = vadd.f32 %v1000_v58, %v672_v56 }
 0x10b   : > { %v1036_v60 = vpop.f32.mrb[8].mxu1 }
 0x10c   : > { %v807_v61 = vpop.f32.mrb[9].mxu1 }
 0x10d   : > { %v1037_v62 = vpop.f32.mrb[10].mxu1 }
 0x10e   : > { %v810_v63 = vpop.f32.mrb[11].mxu1 }
 0x119   : > { %v1017_v0 = vpop.f32.mrb[8].mxu0 }
 0x11a   : > { %v1018_v1 = vpop.f32.mrb[9].mxu0 }
 0x11b   : > { %v1019_v2 = vadd.f32 %v1018_v1, %v1017_v0  ;;  %v1020_v3 = vpop.f32.mrb[10].mxu0 }
 0x11c   : > { %v1021_v4 = vpop.f32.mrb[11].mxu0 }
 0x11d   : > { %v1022_v5 = vadd.f32 %v1021_v4, %v1020_v3  ;;  %v759_v6 = vadd.f32 %v1019_v2, %v710_v41 }
 0x11f   : > { %v808_v7 = vadd.f32 %v807_v61, %v759_v6  ;;  %v762_v8 = vadd.f32 %v1022_v5, %v713_v43 }
 0x121   : > { %822 = vst [vmem:[%s175_s22] sm:$0xff] %v808_v7  ;;  %v811_v9 = vadd.f32 %v810_v63, %v762_v8  ;;  %v1023_v10 = vpop.f32.mrb[12].mxu0 }
 0x122   : > { %v1024_v11 = vpop.f32.mrb[13].mxu0 }
 0x123   : > { %823 = vst [vmem:[%s175_s22 + $0x8] sm:$0xff] %v811_v9  ;;  %v1025_v12 = vadd.f32 %v1024_v11, %v1023_v10  ;;  %v1026_v13 = vpop.f32.mrb[14].mxu0 }
 0x124   : > { %v1027_v14 = vpop.f32.mrb[15].mxu0 }
 0x125   : > { %v767_v15 = vadd.f32 %v1025_v12, %v718_v57  ;;  %v1028_v16 = vadd.f32 %v1027_v14, %v1026_v13 }
 0x127   : > { %v816_v17 = vadd.f32 %v1036_v60, %v767_v15  ;;  %v770_v18 = vadd.f32 %v1028_v16, %v721_v59 }
 0x129   : > { %824 = vst [vmem:[%s175_s22 + $0x10] sm:$0xff] %v816_v17  ;;  %v819_v19 = vadd.f32 %v1037_v62, %v770_v18 }
 0x12b   : > { %825 = vst [vmem:[%s175_s22 + $0x18] sm:$0xff] %v819_v19 }
 0x12c PF: > { %s13_s12 = sadd.s32 1, %s1102_s12  }
 0x12d   : > { %p10_p4 = scmp.ge.s32.totalorder %s13_s12, 4  }
 0x12f   :  { %12 = sbr.rel (!%p10_p4) target bundleno = 1 (0x1), region = 62 }

</bundles_post_ra>
